<compile_context>
chip_gen: v5e
topology: v5e:2x2
jax: 0.10.0
libtpu: 0.0.40
codegen_flags: <defaults>
</compile_context>

<pallas_src>
from math import exp, sqrt

import jax
import jax.numpy as jnp
from jax.experimental import pallas as pl
from jax.experimental.pallas import tpu as pltpu


def _round_up(x, m):
    return ((x + m - 1) // m) * m


def _make_kernel(layer_specs, action_dim, sigma_lo, sigma_hi):
    """layer_specs: list of (row_offset, in_dim, out_dim) for hidden layers then
    the fused (mu||std) head.  Weights are (out, in); activations are
    (features, batch_tile)."""
    n_layers = len(layer_specs)

    def kernel(obs_ref, w_ref, b_ref, out_ref):
        h = obs_ref[...].astype(jnp.float32)                     # (obs_dim, tile_b)
        head = None
        for l, (off, in_l, out_l) in enumerate(layer_specs):
            w = w_ref[off:off + out_l, 0:in_l]                   # (out_l, in_l) f32
            b = b_ref[off:off + out_l, :]                        # (out_l, 1)  f32
            z = jnp.dot(w, h, preferred_element_type=jnp.float32) + b
            if l < n_layers - 1:
                h = jnp.maximum(z, 0.0)                          # ReLU on VPU
            else:
                head = z                                         # (2*A, tile_b)
        sig = jax.nn.softplus(head)                              # std head (EUP)
        if (sigma_lo is not None) and (sigma_hi is not None):
            # torch.clamp(std_net(emb), exp(log_sigma_min), exp(log_sigma_max))
            sig = jnp.clip(sig, sigma_lo, sigma_hi)
        # Sublane-select: rows [0, A) -> mu (identity), rows [A, 2A) -> sigma.
        row = jax.lax.broadcasted_iota(jnp.int32, head.shape, 0)
        out_ref[...] = jnp.where(row < action_dim, head, sig).astype(out_ref.dtype)

    return kernel


def _auto_batch_tile(B, row_bytes, num_cores=1, vmem_budget=40 << 20):
    """Pick the batch tile (lanes dimension).

    Single-TC chips (v5e/v6e): one grid step (tile = B) whenever it fits the
    VMEM budget -- extra grid steps are pure sequential overhead.
    num_cores > 1 (v7x): split the batch across cores when it divides cleanly
    into multiple-of-128 tiles.
    """
    if num_cores > 1 and B % (num_cores * 128) == 0:
        t = B // num_cores
    else:
        t = B
    # Shrink (keeping a multiple-of-128 divisor of B) only if over the budget.
    while t * row_bytes > vmem_budget and t % 2 == 0 and (t // 2) % 128 == 0:
        t //= 2
    return t


def tanh_gauss_policy_forward(obs, params, *, log_sigma_min=None, log_sigma_max=None,
                              batch_tile=None, num_cores=1):
    """Run the AmortisedGaussNet MLP in a single Pallas kernel.

    obs: (B, obs_dim) float32 (PyTorch layout; transposed to batch-on-lanes here).
    params: dict with
      'hidden': list of (W (out, in), b (out,))  -- PyTorch-native Linear storage
      'mu':     (W (action_dim, h_last), b (action_dim,))
      'std':    (W (action_dim, h_last), b (action_dim,))
    num_cores: set to 2 on v7x to CORE_PARALLEL-split the batch over both
      TensorCores (default 1 = single grid step, right for v5e/v6e).
    Returns (mu, sigma), each (B, action_dim) float32 -- the parameters of the
    TanhGauss(Normal(mu, sigma)) distribution the PyTorch module returns.
    """
    B, obs_dim = obs.shape
    hidden = params["hidden"]
    w_mu, b_mu = params["mu"]
    w_std, b_std = params["std"]
    action_dim = w_mu.shape[0]
    out_dim = 2 * action_dim

    # ---- fused head + single weight/bias slabs (3 input streams total) ----
    w_head = jnp.concatenate([w_mu, w_std], axis=0)          # (2A, h_last)
    b_head = jnp.concatenate([b_mu, b_std], axis=0)          # (2A,)
    layers = list(hidden) + [(w_head, b_head)]

    max_in = max(w.shape[1] for (w, _) in layers)
    layer_specs = []
    off = 0
    for (w, _) in layers:
        out_l, in_l = w.shape
        layer_specs.append((off, in_l, out_l))
        off += _round_up(out_l, 8)                            # 8-aligned row blocks
    total_rows = _round_up(off, 8)

    w_slab = jnp.zeros((total_rows, max_in), jnp.float32)
    b_slab = jnp.zeros((total_rows, 1), jnp.float32)
    for (o, in_l, out_l), (w, b) in zip(layer_specs, layers):
        w_slab = w_slab.at[o:o + out_l, 0:in_l].set(w.astype(jnp.float32))
        b_slab = b_slab.at[o:o + out_l, 0].set(b.astype(jnp.float32))

    # ---- batch tiling (lanes) ----
    row_bytes = 2 * (obs_dim + out_dim) * 4                   # double-buffered obs+out
    if batch_tile is None:
        batch_tile = _auto_batch_tile(B, row_bytes, num_cores=num_cores)
    assert B % batch_tile == 0
    assert batch_tile == B or batch_tile % 128 == 0, (
        "batch_tile must equal B or be a multiple of 128 (lane dimension)")
    grid = (B // batch_tile,)

    if grid[0] == 1:
        dim_sem = ("arbitrary",)
    elif num_cores > 1 and hasattr(pltpu, "CORE_PARALLEL"):
        # v7x: actually split grid steps across the 2 TensorCores.
        dim_sem = (pltpu.CORE_PARALLEL,)
    else:
        dim_sem = ("parallel",)

    clamp = (log_sigma_min is not None) and (log_sigma_max is not None)
    sigma_lo = exp(log_sigma_min) if clamp else None
    sigma_hi = exp(log_sigma_max) if clamp else None
    # TODO(synk): sigma_lo/sigma_hi and layer shapes are baked into the kernel
    # closure, so each distinct config triggers a (cheap) recompile.
    kernel = _make_kernel(layer_specs, action_dim, sigma_lo, sigma_hi)

    # Grid-invariant weight/bias slabs.  Single-buffer them only when large
    # (v7x 64 MiB VMEM hazard); at small sizes the default is fine.
    slab_bytes = int(w_slab.size + b_slab.size) * 4
    if slab_bytes > (8 << 20):
        invariant = lambda shape: pl.BlockSpec(shape, lambda i: (0, 0),
                                               pipeline_mode=pl.Buffered(1))
        slab_bufs = 1
    else:
        invariant = lambda shape: pl.BlockSpec(shape, lambda i: (0, 0))
        slab_bufs = 2

    obs_t = obs.T                                             # layout plumbing only
    in_specs = [
        pl.BlockSpec((obs_dim, batch_tile), lambda i: (0, i)),
        invariant(w_slab.shape),
        invariant(b_slab.shape),
    ]
    out_specs = pl.BlockSpec((out_dim, batch_tile), lambda i: (0, i))
    out_shape = jax.ShapeDtypeStruct((out_dim, B), jnp.float32)

    # Advisory cost estimate for XLA scheduling around this tiny custom call.
    flops = sum(2 * B * in_l * out_l for (_, in_l, out_l) in layer_specs)
    bytes_accessed = obs.size * 4 + slab_bytes + B * out_dim * 4
    cost = pl.CostEstimate(flops=int(flops),
                           transcendentals=int(B * out_dim),
                           bytes_accessed=int(bytes_accessed))

    # VMEM: double-buffered obs/out tiles + slabs; no artificial floor.
    vmem_needed = (2 * batch_tile * obs_dim * 4
                   + 2 * batch_tile * out_dim * 4
                   + slab_bufs * slab_bytes)
    vmem_limit = int(min(96 << 20, vmem_needed + (8 << 20)))

    out = pl.pallas_call(
        kernel,
        out_shape=out_shape,
        grid_spec=pltpu.PrefetchScalarGridSpec(
            num_scalar_prefetch=0,
            grid=grid,
            in_specs=in_specs,
            out_specs=out_specs,
        ),
        compiler_params=pltpu.CompilerParams(
            dimension_semantics=dim_sem,
            vmem_limit_bytes=vmem_limit,
        ),
        cost_estimate=cost,
    )(obs_t, w_slab, b_slab)

    mu = out[:action_dim, :].T                                # (B, A)
    sigma = out[action_dim:, :].T                             # (B, A)
    return mu, sigma


def init_params(key, obs_dim, action_dim, hiddens):
    """PyTorch-Linear-style init U(-1/sqrt(fan_in), 1/sqrt(fan_in)); weights (out, in)."""
    params = {"hidden": []}
    dims = [obs_dim] + list(hiddens)
    for i in range(len(hiddens)):
        fan_in, fan_out = dims[i], dims[i + 1]
        key, kw, kb = jax.random.split(key, 3)
        bound = 1.0 / sqrt(fan_in)
        w = jax.random.uniform(kw, (fan_out, fan_in), jnp.float32, -bound, bound)
        b = jax.random.uniform(kb, (fan_out,), jnp.float32, -bound, bound)
        params["hidden"].append((w, b))
    fan_in = hiddens[-1]
    bound = 1.0 / sqrt(fan_in)
    for name in ("mu", "std"):
        key, kw, kb = jax.random.split(key, 3)
        w = jax.random.uniform(kw, (action_dim, fan_in), jnp.float32, -bound, bound)
        b = jax.random.uniform(kb, (action_dim,), jnp.float32, -bound, bound)
        params[name] = (w, b)
    return params


def reference_forward(obs, params, log_sigma_min=None, log_sigma_max=None):
    """Pure-JAX reference matching the PyTorch forward semantics (weights (out, in))."""
    h = obs
    for (w, b) in params["hidden"]:
        h = jnp.maximum(h @ w.T + b, 0.0)
    mu = h @ params["mu"][0].T + params["mu"][1]
    sigma = jax.nn.softplus(h @ params["std"][0].T + params["std"][1])
    if (log_sigma_min is not None) and (log_sigma_max is not None):
        sigma = jnp.clip(sigma, exp(log_sigma_min), exp(log_sigma_max))
    return mu, sigma


if __name__ == "__main__":
    # Small shapes consistent with the module: obs vector input, MLP hiddens.
    obs_dim, action_dim = 16, 4
    hiddens = [32, 32]
    batch = 256

    key = jax.random.PRNGKey(0)
    key, k_obs = jax.random.split(key)
    obs = jax.random.normal(k_obs, (batch, obs_dim), jnp.float32)
    params = init_params(key, obs_dim, action_dim, hiddens)

    # TanhGaussPolicy.forward returns TanhGauss(Normal(mu, sigma)); (mu, sigma)
    # fully parameterise that distribution.
    # TODO(synk): the TanhGauss distribution-object wrapper (sampling / log_prob)
    # has no tensor compute in forward and is not a kernel op.
    # TODO(synk): with_layer_norm / with_batch_norm options (default False) are
    # not implemented in the kernel.
    # TODO(synk): on v7x, pass num_cores=2 to CORE_PARALLEL-split the batch
    # across both TensorCores; default (1) keeps grid=(1,) for single-TC chips.

    # Unclamped sigma path.
    mu, sigma = tanh_gauss_policy_forward(obs, params)
    jax.block_until_ready((mu, sigma))
    mu_ref, sigma_ref = reference_forward(obs, params)
    assert jnp.allclose(mu, mu_ref, atol=2e-5, rtol=2e-5)
    assert jnp.allclose(sigma, sigma_ref, atol=2e-5, rtol=2e-5)
    assert bool(jnp.all(sigma > 0))

    # Clamped sigma path (log_sigma_min / log_sigma_max set on the module).
    mu_c, sigma_c = tanh_gauss_policy_forward(
        obs, params, log_sigma_min=-5.0, log_sigma_max=0.5)
    jax.block_until_ready((mu_c, sigma_c))
    mu_cr, sigma_cr = reference_forward(
        obs, params, log_sigma_min=-5.0, log_sigma_max=0.5)
    assert jnp.allclose(mu_c, mu_cr, atol=2e-5, rtol=2e-5)
    assert jnp.allclose(sigma_c, sigma_cr, atol=2e-5, rtol=2e-5)
    assert bool(jnp.all(sigma_c >= exp(-5.0) - 1e-6))
    assert bool(jnp.all(sigma_c <= exp(0.5) + 1e-6))

    print("KERNEL_OK")
</pallas_src>

<mosaic_0001>
module attributes {stable_mosaic.version = 11 : i64} {
  func.func @kernel(%arg0: i32, %arg1: memref<16x256xf32, #tpu.memory_space<vmem>>, %arg2: memref<72x32xf32, #tpu.memory_space<vmem>>, %arg3: memref<72x1xf32, #tpu.memory_space<vmem>>, %arg4: memref<8x256xf32, #tpu.memory_space<vmem>>) attributes {dimension_semantics = [#tpu.dimension_semantics<arbitrary>], iteration_bounds = array<i64: 1>, scalar_prefetch = 0 : i64, scratch_operands = 0 : i64, tpu.core_type = #tpu.core_type<tc>, window_params = [{transform_indices = @transform_0, window_bounds = array<i64: 16, 256>}, {pipeline_mode = #tpu.pipeline_mode<synchronous>, transform_indices = @transform_1, window_bounds = array<i64: 72, 32>}, {pipeline_mode = #tpu.pipeline_mode<synchronous>, transform_indices = @transform_2, window_bounds = array<i64: 72, 1>}, {transform_indices = @transform_3, window_bounds = array<i64: 8, 256>}]} {
    %c0 = arith.constant 0 : index
    %c0_0 = arith.constant 0 : index
    %0 = vector.load %arg1[%c0, %c0_0] : memref<16x256xf32, #tpu.memory_space<vmem>>, vector<16x256xf32>
    %c0_1 = arith.constant 0 : index
    %c0_2 = arith.constant 0 : index
    %1 = vector.load %arg2[%c0_1, %c0_2] : memref<72x32xf32, #tpu.memory_space<vmem>>, vector<32x16xf32>
    %c0_3 = arith.constant 0 : index
    %c0_4 = arith.constant 0 : index
    %2 = vector.load %arg3[%c0_3, %c0_4] : memref<72x1xf32, #tpu.memory_space<vmem>>, vector<32x1xf32>
    %cst = arith.constant dense<0.000000e+00> : vector<32x256xf32>
    %3 = tpu.matmul %1, %0, %cst {dimension_numbers = #tpu.dot_dimension_numbers<[1], [0], [0], [1], [0, 0, 1, 1], [], []>} : vector<32x16xf32>, vector<16x256xf32>, vector<32x256xf32> -> vector<32x256xf32>
    %4 = vector.broadcast %2 : vector<32x1xf32> to vector<32x256xf32>
    %5 = arith.addf %3, %4 : vector<32x256xf32>
    %cst_5 = arith.constant 0.000000e+00 : f32
    %6 = vector.broadcast %cst_5 : f32 to vector<32x256xf32>
    %7 = arith.maximumf %5, %6 : vector<32x256xf32>
    %c32 = arith.constant 32 : index
    %c0_6 = arith.constant 0 : index
    %8 = vector.load %arg2[%c32, %c0_6] : memref<72x32xf32, #tpu.memory_space<vmem>>, vector<32x32xf32>
    %c32_7 = arith.constant 32 : index
    %c0_8 = arith.constant 0 : index
    %9 = vector.load %arg3[%c32_7, %c0_8] : memref<72x1xf32, #tpu.memory_space<vmem>>, vector<32x1xf32>
    %cst_9 = arith.constant dense<0.000000e+00> : vector<32x256xf32>
    %10 = tpu.matmul %8, %7, %cst_9 {dimension_numbers = #tpu.dot_dimension_numbers<[1], [0], [0], [1], [0, 0, 1, 1], [], []>} : vector<32x32xf32>, vector<32x256xf32>, vector<32x256xf32> -> vector<32x256xf32>
    %11 = vector.broadcast %9 : vector<32x1xf32> to vector<32x256xf32>
    %12 = arith.addf %10, %11 : vector<32x256xf32>
    %cst_10 = arith.constant 0.000000e+00 : f32
    %13 = vector.broadcast %cst_10 : f32 to vector<32x256xf32>
    %14 = arith.maximumf %12, %13 : vector<32x256xf32>
    %c64 = arith.constant 64 : index
    %c0_11 = arith.constant 0 : index
    %15 = vector.load %arg2[%c64, %c0_11] : memref<72x32xf32, #tpu.memory_space<vmem>>, vector<8x32xf32>
    %c64_12 = arith.constant 64 : index
    %c0_13 = arith.constant 0 : index
    %16 = vector.load %arg3[%c64_12, %c0_13] : memref<72x1xf32, #tpu.memory_space<vmem>>, vector<8x1xf32>
    %cst_14 = arith.constant dense<0.000000e+00> : vector<8x256xf32>
    %17 = tpu.matmul %15, %14, %cst_14 {dimension_numbers = #tpu.dot_dimension_numbers<[1], [0], [0], [1], [0, 0, 1, 1], [], []>} : vector<8x32xf32>, vector<32x256xf32>, vector<8x256xf32> -> vector<8x256xf32>
    %18 = vector.broadcast %16 : vector<8x1xf32> to vector<8x256xf32>
    %19 = arith.addf %17, %18 : vector<8x256xf32>
    %cst_15 = arith.constant 0.000000e+00 : f32
    %20 = vector.broadcast %cst_15 : f32 to vector<8x256xf32>
    %21 = arith.maximumf %19, %20 : vector<8x256xf32>
    %22 = vector.broadcast %cst_15 : f32 to vector<8x256xf32>
    %23 = arith.subf %19, %22 : vector<8x256xf32>
    %24 = arith.cmpf one, %23, %23 : vector<8x256xf32>
    %25 = vector.broadcast %cst_15 : f32 to vector<8x256xf32>
    %26 = arith.addf %19, %25 : vector<8x256xf32>
    %27 = math.absf %23 : vector<8x256xf32>
    %cst_16 = arith.constant 0.000000e+00 : f32
    %28 = vector.broadcast %cst_16 : f32 to vector<8x256xf32>
    %29 = arith.subf %28, %27 : vector<8x256xf32>
    %30 = math.exp %29 : vector<8x256xf32>
    %31 = math.log1p %30 : vector<8x256xf32>
    %32 = arith.addf %21, %31 : vector<8x256xf32>
    %33 = arith.select %24, %26, %32 : vector<8x256xi1>, vector<8x256xf32>
    %34 = tpu.iota {dimensions = array<i32: 0>} : vector<8x256xi32>
    %c4_i32 = arith.constant 4 : i32
    %35 = vector.broadcast %c4_i32 : i32 to vector<8x256xi32>
    %36 = arith.cmpi slt, %34, %35 : vector<8x256xi32>
    %37 = arith.select %36, %19, %33 : vector<8x256xi1>, vector<8x256xf32>
    %c0_17 = arith.constant 0 : index
    %c0_18 = arith.constant 0 : index
    %38 = vector.load %arg4[%c0_17, %c0_18] : memref<8x256xf32, #tpu.memory_space<vmem>>, vector<8x256xf32>
    tpu.vector_store %arg4[%c0_17, %c0_18], %37 {strides = array<i32>} : memref<8x256xf32, #tpu.memory_space<vmem>>, vector<8x256xf32>,
    return
  }
  func.func @transform_0(%arg0: i32) -> (i32, i32) {
    %c0_i32 = arith.constant 0 : i32
    %c0_i32_0 = arith.constant 0 : i32
    return %c0_i32, %arg0 : i32, i32
  }
  func.func @transform_1(%arg0: i32) -> (i32, i32) {
    %c0_i32 = arith.constant 0 : i32
    %c0_i32_0 = arith.constant 0 : i32
    %c0_i32_1 = arith.constant 0 : i32
    return %c0_i32, %c0_i32_0 : i32, i32
  }
  func.func @transform_2(%arg0: i32) -> (i32, i32) {
    %c0_i32 = arith.constant 0 : i32
    %c0_i32_0 = arith.constant 0 : i32
    %c0_i32_1 = arith.constant 0 : i32
    return %c0_i32, %c0_i32_0 : i32, i32
  }
  func.func @transform_3(%arg0: i32) -> (i32, i32) {
    %c0_i32 = arith.constant 0 : i32
    %c0_i32_0 = arith.constant 0 : i32
    return %c0_i32, %arg0 : i32, i32
  }
}

</mosaic_0001>

<bundles_post_ra>
// kernel: tpu_custom_call.1
= control target key start
LH: loop header
LB: loop body
LE: loop exit
PB: predicated region body
PF: predicated region fallthrough
CT: control target
= control target key end

     0   :  { %vm47_vm0 = vcmask 130048   ;;  %v399_v5 = vmov 0   ;;  %s508_s0 = inlined_call_operand.vmem [shape: f32[16,256], index: 0, kind: input, shape index: {}]   ;;  %s509_s1 = inlined_call_operand.vmem [shape: f32[72,32], index: 1, kind: input, shape index: {}]   ;;  %s510_s2 = inlined_call_operand.vmem [shape: f32[72,1], index: 2, kind: input, shape index: {}]   ;;  %s511_s3 = inlined_call_operand.hbm [shape: f32[8,256], index: 3, kind: output, shape index: {}]  }
   0x1   :  { %v17_v0 = vld [vmem:[%s508_s0 + $0x10] sm:$0xff]  ;;  %v18_v1 = vld [vmem:[%s508_s0 + $0x18] sm:$0xff]  ;;  %v15_v2 = vld [vmem:[%s508_s0] sm:$0xff]  ;;  %363 = vset.pattern.permute.xlu1 %v399_v5  ;;  %362 = vset.pattern.permute.xlu0 %v399_v5 }
   0x2   :  { %74 = vmatpush.msra.mxu0 %v17_v0  ;;  %103 = vmatpush.msra.mxu1 %v18_v1  ;;  %v16_v3 = vld [vmem:[%s508_s0 + $0x8] sm:$0xff]  ;;  %v19_v4 = vld [vmem:[%s509_s1] sm:$0xff]  ;;  %v26_v7 = vld [vmem:[%s510_s2 + $0x18] sm:$0xff] }
   0x3   :  { %v24_v6 = vld [vmem:[%s510_s2 + $0x8] sm:$0xff] }
   0x4   :  { %75 = vmatpush.msra.mxu0 %v15_v2  ;;  %104 = vmatpush.msra.mxu1 %v16_v3 }
   0x5   :  { %342 = vmatmul.msk.f32.vlgmr.msra.gmra.mxu0 %vm47_vm0, %v19_v4  ;;  %346 = vmatmul.msk.f32.vlgmr.msra.gmra.mxu1 %vm47_vm0, %v19_v4 }
   0x6   :  { %8 = vsyncpa [#allocation3], 0  ;;  %34 = vperm.xlu1 %363, %v24_v6   ;;  %44 = vperm.xlu0 %362, %v26_v7   ;;  %v20_v8 = vld [vmem:[%s509_s1 + $0x8] sm:$0xff]  ;;  %v23_v9 = vld [vmem:[%s510_s2] sm:$0xff]  ;;  %vm154_vm1 = vcmask 261120   ;;  %s333_s29 = sshll.u32 %s511_s3, 4  ;;  %s334_s29 = int_to_ptr.hbm [resolvable:$true] %s333_s29 }
   0x7   :  { %364 = vset.pattern.permute.xlu2 %v399_v5  ;;  %v25_v10 = vld [vmem:[%s510_s2 + $0x10] sm:$0xff]  ;;  %v131_v12 = vld [vmem:[%s510_s2 + $0x28] sm:$0xff]  ;;  %v130_v13 = vld [vmem:[%s510_s2 + $0x20] sm:$0xff] }
   0x8   :  { %v21_v11 = vld [vmem:[%s509_s1 + $0x10] sm:$0xff]  ;;  %v22_v14 = vld [vmem:[%s509_s1 + $0x18] sm:$0xff]  ;;  %v126_v44 = vld [vmem:[%s509_s1 + $0x20] sm:$0xff] }
   0x9   :  { %v133_v35 = vld [vmem:[%s510_s2 + $0x38] sm:$0xff]  ;;  %v132_v45 = vld [vmem:[%s510_s2 + $0x30] sm:$0xff]  ;;  %v127_v46 = vld [vmem:[%s509_s1 + $0x28] sm:$0xff] }
   0xa   :  { %151 = vperm.xlu2 %364, %v133_v35   ;;  %v234_v47 = vld [vmem:[%s510_s2 + $0x40] sm:$0xff]  ;;  %v128_v48 = vld [vmem:[%s509_s1 + $0x30] sm:$0xff]  ;;  %v129_v49 = vld [vmem:[%s509_s1 + $0x38] sm:$0xff] }
   0xd   :  { %343 = vmatmul.msk.f32.gmra.mxu0 %vm47_vm0, %v20_v8  ;;  %347 = vmatmul.msk.f32.gmra.mxu1 %vm47_vm0, %v20_v8 }
   0xe   :  { %29 = vperm.xlu1 %363, %v23_v9   ;;  %39 = vperm.xlu0 %362, %v25_v10  }
  0x12   :  { %146 = vperm.xlu2 %364, %v132_v45  }
  0x15   :  { %344 = vmatmul.msk.f32.gmra.mxu0 %vm47_vm0, %v21_v11  ;;  %348 = vmatmul.msk.f32.gmra.mxu1 %vm47_vm0, %v21_v11 }
  0x16   :  { %141 = vperm.xlu0 %362, %v131_v12   ;;  %136 = vperm.xlu1 %363, %v130_v13  }
  0x1a   :  { %237 = vperm.xlu2 %364, %v234_v47  }
  0x1d   :  { %345 = vmatmul.msk.f32.gmra.mxu0 %vm47_vm0, %v22_v14  ;;  %349 = vmatmul.msk.f32.gmra.mxu1 %vm47_vm0, %v22_v14  ;;  %v233_v14 = vld [vmem:[%s509_s1 + $0x40] sm:$0xff]  ;;  %s400_s1 = smov [#allocation2]  }
  0x1e   :  { %s331_s26 = sshll.u32 %s400_s1, 4  ;;  %s332_s26 = int_to_ptr.vmem [resolvable:$true] %s331_s26 }
  0x64   :  { %v152_v54 = vpop.permute.xlu2 %151 }
  0x6c   :  { %v147_v57 = vpop.permute.xlu2 %146 }
  0x78   :  { %v45_v19 = vpop.permute.xlu0 %44  ;;  %v35_v20 = vpop.permute.xlu1 %34 }
  0x80   :  { %v40_v23 = vpop.permute.xlu0 %39  ;;  %v30_v30 = vpop.permute.xlu1 %29 }
  0x82   :  { %v77_v15 = vpop.f32.mrf.mxu0  ;;  %v106_v16 = vpop.f32.mrf.mxu1 }
  0x83   :  { %v78_v36 = vadd.f32 %v77_v15, %v30_v30  ;;  %v107_v37 = vadd.f32 %v106_v16, %v30_v30  ;;  %v238_v15 = vpop.permute.xlu2 %237 }
  0x85   :  { %v118_v42 = vmax.f32 %v78_v36, 0.0  ;;  %v119_v43 = vmax.f32 %v107_v37, 0.0 }
  0x88   :  { %v142_v0 = vpop.permute.xlu0 %141  ;;  %v137_v5 = vpop.permute.xlu1 %136 }
  0x8a   :  { %v80_v17 = vpop.f32.mrf.mxu0  ;;  %v109_v18 = vpop.f32.mrf.mxu1 }
  0x8b   :  { %v81_v31 = vadd.f32 %v80_v17, %v35_v20  ;;  %v110_v32 = vadd.f32 %v109_v18, %v35_v20 }
  0x8d   :  { %v120_v40 = vmax.f32 %v81_v31, 0.0  ;;  %v121_v41 = vmax.f32 %v110_v32, 0.0  ;;  %v319_v32 = vlaneseq }
  0x92   :  { %v83_v21 = vpop.f32.mrf.mxu0  ;;  %v112_v22 = vpop.f32.mrf.mxu1 }
  0x93   :  { %v84_v26 = vadd.f32 %v83_v21, %v40_v23  ;;  %v113_v27 = vadd.f32 %v112_v22, %v40_v23 }
  0x95   :  { %v122_v38 = vmax.f32 %v84_v26, 0.0  ;;  %v123_v39 = vmax.f32 %v113_v27, 0.0 }
  0x9a   :  { %v86_v24 = vpop.f32.mrf.mxu0  ;;  %v115_v25 = vpop.f32.mrf.mxu1 }
  0x9b   :  { %v87_v28 = vadd.f32 %v86_v24, %v45_v19  ;;  %v116_v29 = vadd.f32 %v115_v25, %v45_v19 }
  0x9d   :  { %v124_v33 = vmax.f32 %v87_v28, 0.0  ;;  %v125_v34 = vmax.f32 %v116_v29, 0.0 }
  0x9f   :  { %179 = vmatpush.msra.mxu2 %v124_v33  ;;  %208 = vmatpush.msra.mxu3 %v125_v34 }
  0xa1   :  { %180 = vmatpush.msra.mxu2 %v122_v38  ;;  %209 = vmatpush.msra.mxu3 %v123_v39  ;;  %v320_v38 = vshrl.u32 %v319_v32, 7 }
  0xa3   :  { %181 = vmatpush.msra.mxu2 %v120_v40  ;;  %210 = vmatpush.msra.mxu3 %v121_v41  ;;  %vm321_vm4 = vcmp.lt.s32.totalorder %v320_v38, 4 }
  0xa5   :  { %182 = vmatpush.msra.mxu2 %v118_v42  ;;  %211 = vmatpush.msra.mxu3 %v119_v43 }
  0xa6   :  { %350 = vmatmul.msk.f32.vlgmr.msra.gmra.mxu2 %vm154_vm1, %v126_v44  ;;  %354 = vmatmul.msk.f32.vlgmr.msra.gmra.mxu3 %vm154_vm1, %v126_v44 }
  0xae   :  { %351 = vmatmul.msk.f32.gmra.mxu2 %vm154_vm1, %v127_v46  ;;  %355 = vmatmul.msk.f32.gmra.mxu3 %vm154_vm1, %v127_v46 }
  0xb6   :  { %352 = vmatmul.msk.f32.gmra.mxu2 %vm154_vm1, %v128_v48  ;;  %356 = vmatmul.msk.f32.gmra.mxu3 %vm154_vm1, %v128_v48 }
  0xbe   :  { %353 = vmatmul.msk.f32.gmra.mxu2 %vm154_vm1, %v129_v49  ;;  %357 = vmatmul.msk.f32.gmra.mxu3 %vm154_vm1, %v129_v49 }
 0x129   :  { %v184_v50 = vpop.f32.mrf.mxu2  ;;  %v213_v51 = vpop.f32.mrf.mxu3 }
 0x12a   :  { %v185_v6 = vadd.f32 %v184_v50, %v137_v5  ;;  %v214_v7 = vadd.f32 %v213_v51, %v137_v5 }
 0x12c   :  { %v225_v12 = vmax.f32 %v185_v6, 0.0  ;;  %v226_v13 = vmax.f32 %v214_v7, 0.0 }
 0x131   :  { %v187_v52 = vpop.f32.mrf.mxu2  ;;  %v216_v53 = vpop.f32.mrf.mxu3 }
 0x132   :  { %v188_v1 = vadd.f32 %v187_v52, %v142_v0  ;;  %v217_v2 = vadd.f32 %v216_v53, %v142_v0 }
 0x134   :  { %v227_v10 = vmax.f32 %v188_v1, 0.0  ;;  %v228_v11 = vmax.f32 %v217_v2, 0.0 }
 0x139   :  { %v190_v55 = vpop.f32.mrf.mxu2  ;;  %v219_v56 = vpop.f32.mrf.mxu3 }
 0x13a   :  { %v191_v60 = vadd.f32 %v190_v55, %v147_v57  ;;  %v220_v61 = vadd.f32 %v219_v56, %v147_v57 }
 0x13c   :  { %v229_v8 = vmax.f32 %v191_v60, 0.0  ;;  %v230_v9 = vmax.f32 %v220_v61, 0.0 }
 0x141   :  { %v193_v58 = vpop.f32.mrf.mxu2  ;;  %v222_v59 = vpop.f32.mrf.mxu3 }
 0x142   :  { %v194_v62 = vadd.f32 %v193_v58, %v152_v54  ;;  %v223_v63 = vadd.f32 %v222_v59, %v152_v54 }
 0x144   :  { %v231_v3 = vmax.f32 %v194_v62, 0.0  ;;  %v232_v4 = vmax.f32 %v223_v63, 0.0 }
 0x146   :  { %255 = vmatpush.msrb.mxu0 %v231_v3  ;;  %275 = vmatpush.msrb.mxu1 %v232_v4 }
 0x148   :  { %256 = vmatpush.msrb.mxu0 %v229_v8  ;;  %276 = vmatpush.msrb.mxu1 %v230_v9 }
 0x14a   :  { %257 = vmatpush.msrb.mxu0 %v227_v10  ;;  %277 = vmatpush.msrb.mxu1 %v228_v11 }
 0x14c   :  { %258 = vmatpush.msrb.mxu0 %v225_v12  ;;  %278 = vmatpush.msrb.mxu1 %v226_v13 }
 0x14d   :  { %358 = vmatmul.msk.f32.vlgmr.msrb.gmra.mxu0 %vm154_vm1, %v233_v14  ;;  %359 = vmatmul.msk.f32.vlgmr.msrb.gmra.mxu1 %vm154_vm1, %v233_v14 }
 0x1ca   :  { %v260_v16 = vpop.f32.mrf.mxu0  ;;  %v280_v17 = vpop.f32.mrf.mxu1 }
 0x1cb   :  { %v261_v18 = vadd.f32 %v260_v16, %v238_v15  ;;  %v281_v19 = vadd.f32 %v280_v17, %v238_v15 }
 0x1cd   :  { %v289_v20 = vand.u32 2147483647, %v261_v18  ;;  %v290_v21 = vand.u32 2147483647, %v281_v19  ;;  %v283_v42 = vmax.f32 %v261_v18, 0.0  ;;  %v284_v45 = vmax.f32 %v281_v19, 0.0 }
 0x1ce   :  { %vm285_vm5 = vcmp.ne.f32.partialorder %v261_v18, %v261_v18  ;;  %vm286_vm6 = vcmp.ne.f32.partialorder %v281_v19, %v281_v19 }
 0x1cf   :  { %v291_v22 = vsub.f32 0.0, %v289_v20  ;;  %v292_v23 = vsub.f32 0.0, %v290_v21 }
 0x1d1   :  { %v293_v24 = vmul.f32 1.442695, %v291_v22  ;;  %v295_v25 = vmul.f32 1.442695, %v292_v23 }
 0x1d3   :  { %365 = vpow2.f32 %v293_v24 }
 0x1d4   :  { %367 = vpow2.f32 %v295_v25 }
 0x1d9   :  { %v366_v26 = vpop.eup %365 }
 0x1da   :  { %v368_v27 = vpop.eup %367  ;;  %v297_v28 = vadd.f32 1.0, %v366_v26  ;;  %v300_v29 = vmul.f32 -0.5, %v366_v26  ;;  %v303_v34 = vand.u32 2147483647, %v366_v26 }
 0x1db   :  { %v306_v30 = vadd.f32 1.0, %v368_v27  ;;  %v309_v31 = vmul.f32 -0.5, %v368_v27  ;;  %v312_v36 = vand.u32 2147483647, %v368_v27 }
 0x1dc   :  { %369 = vlog2.f32 %v297_v28  ;;  %v301_v33 = vadd.f32 1.0, %v300_v29  ;;  %vm304_vm2 = vcmp.lt.f32.partialorder %v303_v34, 0.0004427343 }
 0x1dd   :  { %371 = vlog2.f32 %v306_v30  ;;  %v310_v35 = vadd.f32 1.0, %v309_v31  ;;  %vm313_vm3 = vcmp.lt.f32.partialorder %v312_v36, 0.0004427343 }
 0x1de   :  { %v302_v41 = vmul.f32 %v366_v26, %v301_v33 }
 0x1df   :  { %v311_v44 = vmul.f32 %v368_v27, %v310_v35 }
 0x1e2   :  { %v370_v37 = vpop.eup %369 }
 0x1e3   :  { %v372_v39 = vpop.eup %371  ;;  %v299_v40 = vmul.f32 0.6931472, %v370_v37 }
 0x1e4   :  { %v308_v43 = vmul.f32 0.6931472, %v372_v39 }
 0x1e5   :  { %v305_v46 = vsel %vm304_vm2, %v302_v41, %v299_v40 }
 0x1e6   :  { %v314_v47 = vsel %vm313_vm3, %v311_v44, %v308_v43  ;;  %v315_v48 = vadd.f32 %v305_v46, %v283_v42 }
 0x1e7   :  { %v316_v49 = vadd.f32 %v314_v47, %v284_v45 }
 0x1e8   :  { %v317_v50 = vsel %vm285_vm5, %v261_v18, %v315_v48 }
 0x1e9   :  { %v318_v51 = vsel %vm286_vm6, %v281_v19, %v316_v49  ;;  %v322_v52 = vsel %vm321_vm4, %v261_v18, %v317_v50 }
 0x1ea   :  { %v323_v53 = vsel %vm321_vm4, %v281_v19, %v318_v51  ;;  %324 = vst [vmem:[#allocation2] sm:$0xff] %v322_v52 }
 0x1eb   :  { %325 = vst [vmem:[#allocation2 + $0x8] sm:$0xff] %v323_v53 }
 0x1ec   :  { %336 = dma.vmem_to_hbm [thread:$0]  %s332_s26, 256, %s334_s29, [#allocation3]  }
 0x1ed   :  { %397 = dma.done.wait [#allocation3], 256  }
 0x1ee   :  { %398 = vsyncadd [#allocation3], 4294967040 }
 0x1ef   :  { %341 = vsyncpa [#allocation3], 1 }

</bundles_post_ra>
